<compile_context>
chip_gen: v5e
topology: v5e:2x2
jax: 0.10.0
libtpu: 0.0.40
codegen_flags: <defaults>
</compile_context>

<pallas_src>
import functools

import jax
import jax.numpy as jnp
from jax.experimental import pallas as pl
from jax.experimental.pallas import tpu as pltpu


def _round_up(x, m):
    return (x + m - 1) // m * m


def _llm_compress_kernel(ids_ref,       # SMEM (N_pad,)  int32 (scalar prefetch)
                         table_hbm,     # ANY  (num_idx, Dllm)  embedding table
                         w_ref,         # VMEM (Dllm, Hpad)     compress W^T
                         b_ref,         # VMEM (1, Hpad)        compress bias
                         llm_out_ref,   # VMEM (TILE, Dllm)     llm embeddings
                         out_ref,       # VMEM (TILE, Hpad)     compressed emb
                         gbuf,          # VMEM scratch (TILE, Dllm)
                         sems):         # DMA semaphore (1,)
    tile = llm_out_ref.shape[0]
    base = pl.program_id(0) * tile

    # --- gather: one row DMA per token; all issued before the first wait ----
    @pl.loop(0, tile)
    def _start(i):
        tok = ids_ref[base + i]
        pltpu.make_async_copy(
            table_hbm.at[pl.ds(tok, 1), :],   # (1, Dllm) row in HBM
            gbuf.at[pl.ds(i, 1), :],          # (1, Dllm) row in VMEM scratch
            sems.at[0],
        ).start()

    @pl.loop(0, tile)
    def _wait(i):
        # Same-shaped descriptor -> same completion amount; shared semaphore.
        pltpu.make_async_copy(
            table_hbm.at[pl.ds(0, 1), :],
            gbuf.at[pl.ds(i, 1), :],
            sems.at[0],
        ).wait()

    gathered = gbuf[...]                                   # (TILE, Dllm)
    llm_out_ref[...] = gathered.astype(llm_out_ref.dtype)

    # --- compress: (TILE, Dllm) @ (Dllm, Hpad) + bias on the MXU -------------
    # NOTE: cast `gathered` / `w_ref` to bf16 here for full-rate MXU + halved
    # HBM traffic on v6e/v7x if the model tolerates it; kept fp32 to match the
    # PyTorch module's numerics.
    acc = jnp.dot(gathered, w_ref[...], preferred_element_type=jnp.float32)
    out_ref[...] = (acc + b_ref[...]).astype(out_ref.dtype)
    # TODO(synk): nn.Dropout not applied (inference/eval semantics -> identity).


@functools.partial(jax.jit, static_argnames=("tile_tokens",))
def llm_compress_embedding(x_ids, table, weight, bias, *, tile_tokens=128):
    """x_ids: (B, S) int ids.  table: (num_idx, Dllm).  weight: (H, Dllm). bias: (H,).

    Returns (embeddings (B, S, H), llm_embeddings (B, S, Dllm)).
    """
    B, S = x_ids.shape
    num_idx, d_llm = table.shape
    h = weight.shape[0]                       # PyTorch Linear weight is (H, Dllm)
    n = B * S

    # Token tile: multiple of 8 sublanes, capped by the (padded) token count.
    tile = max(8, min(tile_tokens, _round_up(n, 8)))
    n_pad = _round_up(n, tile)
    h_pad = _round_up(h, 128)                 # lane-dense output stores

    ids = jnp.clip(x_ids.reshape(n).astype(jnp.int32), 0, num_idx - 1)
    ids = jnp.pad(ids, (0, n_pad - n))        # tail rows just gather row 0

    w_t = jnp.pad(weight.astype(table.dtype).T, ((0, 0), (0, h_pad - h)))
    b2 = jnp.pad(bias.astype(table.dtype).reshape(1, h), ((0, 0), (0, h_pad - h)))

    grid_spec = pltpu.PrefetchScalarGridSpec(
        num_scalar_prefetch=1,
        grid=(n_pad // tile,),
        in_specs=[
            pl.BlockSpec(memory_space=pl.ANY),                       # table (HBM)
            pl.BlockSpec((d_llm, h_pad), lambda i, _ids: (0, 0)),    # W^T (resident)
            pl.BlockSpec((1, h_pad),     lambda i, _ids: (0, 0)),    # bias (resident)
        ],
        out_specs=[
            pl.BlockSpec((tile, d_llm), lambda i, _ids: (i, 0)),     # llm embeddings
            pl.BlockSpec((tile, h_pad), lambda i, _ids: (i, 0)),     # compressed
        ],
        scratch_shapes=[
            pltpu.VMEM((tile, d_llm), table.dtype),                  # gather buffer
            pltpu.SemaphoreType.DMA((1,)),
        ],
    )

    llm_emb, emb = pl.pallas_call(
        _llm_compress_kernel,
        grid_spec=grid_spec,
        out_shape=(
            jax.ShapeDtypeStruct((n_pad, d_llm), table.dtype),
            jax.ShapeDtypeStruct((n_pad, h_pad), table.dtype),
        ),
        compiler_params=pltpu.CompilerParams(
            dimension_semantics=("parallel",)),
    )(ids, table, w_t, b2)

    emb = emb[:n, :h].reshape(B, S, h)
    llm_emb = llm_emb[:n, :].reshape(B, S, d_llm)
    return emb, llm_emb


if __name__ == "__main__":
    # Small, deterministic config.  256 tokens -> 2 token tiles of 128.
    num_idx = 1000        # vocab size (table stays in HBM; never forced to VMEM)
    llm_hidden = 256      # llm_hidden_states
    hidden = 64           # hidden_states (< 128 -> exercises lane padding)
    batch, seq = 4, 64

    key = jax.random.PRNGKey(0)
    k_tab, k_w, k_b, k_x = jax.random.split(key, 4)

    # Synthetic parameters mimicking nn.Embedding / nn.Linear shapes.
    table = jax.random.normal(k_tab, (num_idx, llm_hidden), dtype=jnp.float32)
    weight = jax.random.normal(k_w, (hidden, llm_hidden), dtype=jnp.float32) * 0.05
    bias = jax.random.normal(k_b, (hidden,), dtype=jnp.float32) * 0.01
    x = jax.random.randint(k_x, (batch, seq), 0, num_idx, dtype=jnp.int32)

    emb, llm_emb = llm_compress_embedding(x, table, weight, bias)
    emb = jax.block_until_ready(emb)
    llm_emb = jax.block_until_ready(llm_emb)

    # Pure-JAX reference.
    llm_ref = table[x]                                                  # (B,S,Dllm)
    emb_ref = jnp.einsum("bsd,hd->bsh", llm_ref, weight,
                         precision=jax.lax.Precision.HIGHEST) + bias    # (B,S,H)

    assert emb.shape == (batch, seq, hidden)
    assert llm_emb.shape == (batch, seq, llm_hidden)
    assert jnp.allclose(llm_emb, llm_ref, atol=1e-6, rtol=1e-6)
    assert jnp.allclose(emb, emb_ref, atol=2e-2, rtol=2e-2)

    print("KERNEL_OK")
</pallas_src>

<mosaic_0001>
module attributes {stable_mosaic.version = 11 : i64} {
  func.func @_llm_compress_kernel(%arg0: i32, %arg1: memref<256xi32, #tpu.memory_space<smem>>, %arg2: memref<1000x256xf32, #tpu.memory_space<any>>, %arg3: memref<256x128xf32, #tpu.memory_space<vmem>>, %arg4: memref<1x128xf32, #tpu.memory_space<vmem>>, %arg5: memref<128x256xf32, #tpu.memory_space<vmem>>, %arg6: memref<128x128xf32, #tpu.memory_space<vmem>>, %arg7: memref<128x256xf32, #tpu.memory_space<vmem>>, %arg8: memref<1x!tpu.dma_semaphore, #tpu.memory_space<semaphore_mem>>) attributes {dimension_semantics = [#tpu.dimension_semantics<parallel>], iteration_bounds = array<i64: 2>, scalar_prefetch = 1 : i64, scratch_operands = 2 : i64, tpu.core_type = #tpu.core_type<tc>, window_params = [{}, {pipeline_mode = #tpu.pipeline_mode<synchronous>, transform_indices = @transform_1, window_bounds = array<i64: 256, 128>}, {pipeline_mode = #tpu.pipeline_mode<synchronous>, transform_indices = @transform_2, window_bounds = array<i64: 1, 128>}, {transform_indices = @transform_3, window_bounds = array<i64: 128, 256>}, {transform_indices = @transform_4, window_bounds = array<i64: 128, 128>}]} {
    %c128_i32 = arith.constant 128 : i32
    %0 = arith.muli %arg0, %c128_i32 : i32
    %c0_i32 = arith.constant 0 : i32
    %c128_i32_0 = arith.constant 128 : i32
    %1 = arith.addi %c0_i32, %c128_i32_0 : i32
    %c1_i32 = arith.constant 1 : i32
    scf.for %arg9 = %c0_i32 to %1 step %c1_i32  : i32 {
      %c1_i32_15 = arith.constant 1 : i32
      %11 = arith.muli %arg9, %c1_i32_15 : i32
      %c0_i32_16 = arith.constant 0 : i32
      %12 = arith.addi %c0_i32_16, %11 : i32
      %13 = arith.addi %0, %12 : i32
      %14 = arith.index_cast %13 : i32 to index
      %15 = memref.load %arg1[%14] : memref<256xi32, #tpu.memory_space<smem>>
      %c0_i32_17 = arith.constant 0 : i32
      %c0_i32_18 = arith.constant 0 : i32
      %16 = tpu.memref_slice %arg2[%15, %c0_i32_18] : memref<1000x256xf32, #tpu.memory_space<any>> -> memref<1x256xf32, #tpu.memory_space<any>>
      %c0_i32_19 = arith.constant 0 : i32
      %17 = tpu.memref_slice %arg7[%12, %c0_i32_19] : memref<128x256xf32, #tpu.memory_space<vmem>> -> memref<1x256xf32, #tpu.memory_space<vmem>>
      %18 = tpu.memref_slice %arg8[%c0_i32_17] : memref<1x!tpu.dma_semaphore, #tpu.memory_space<semaphore_mem>> -> memref<1x!tpu.dma_semaphore, #tpu.memory_space<semaphore_mem>>
      %19 = tpu.memref_squeeze %18 : memref<1x!tpu.dma_semaphore, #tpu.memory_space<semaphore_mem>> -> memref<!tpu.dma_semaphore, #tpu.memory_space<semaphore_mem>>
      tpu.enqueue_dma source(%16 : memref<1x256xf32, #tpu.memory_space<any>>) target(%17 : memref<1x256xf32, #tpu.memory_space<vmem>>) target_semaphore(%19 : memref<!tpu.dma_semaphore, #tpu.memory_space<semaphore_mem>>)
    }
    %c128_i32_1 = arith.constant 128 : i32
    %c0_i32_2 = arith.constant 0 : i32
    %c128_i32_3 = arith.constant 128 : i32
    %2 = arith.addi %c0_i32_2, %c128_i32_3 : i32
    %c1_i32_4 = arith.constant 1 : i32
    scf.for %arg9 = %c0_i32_2 to %2 step %c1_i32_4  : i32 {
      %c1_i32_15 = arith.constant 1 : i32
      %11 = arith.muli %arg9, %c1_i32_15 : i32
      %c0_i32_16 = arith.constant 0 : i32
      %12 = arith.addi %c0_i32_16, %11 : i32
      %c0_i32_17 = arith.constant 0 : i32
      %c0_i32_18 = arith.constant 0 : i32
      %c0_i32_19 = arith.constant 0 : i32
      %13 = tpu.memref_slice %arg2[%c0_i32_18, %c0_i32_19] : memref<1000x256xf32, #tpu.memory_space<any>> -> memref<1x256xf32, #tpu.memory_space<any>>
      %c0_i32_20 = arith.constant 0 : i32
      %14 = tpu.memref_slice %arg7[%12, %c0_i32_20] : memref<128x256xf32, #tpu.memory_space<vmem>> -> memref<1x256xf32, #tpu.memory_space<vmem>>
      %15 = tpu.memref_slice %arg8[%c0_i32_17] : memref<1x!tpu.dma_semaphore, #tpu.memory_space<semaphore_mem>> -> memref<1x!tpu.dma_semaphore, #tpu.memory_space<semaphore_mem>>
      %16 = tpu.memref_squeeze %15 : memref<1x!tpu.dma_semaphore, #tpu.memory_space<semaphore_mem>> -> memref<!tpu.dma_semaphore, #tpu.memory_space<semaphore_mem>>
      tpu.wait_dma2 semaphore(%16 : memref<!tpu.dma_semaphore, #tpu.memory_space<semaphore_mem>>) src(%13 : memref<1x256xf32, #tpu.memory_space<any>>) dst(%14 : memref<1x256xf32, #tpu.memory_space<vmem>>)
    }
    %c128_i32_5 = arith.constant 128 : i32
    %c0 = arith.constant 0 : index
    %c0_6 = arith.constant 0 : index
    %3 = vector.load %arg7[%c0, %c0_6] : memref<128x256xf32, #tpu.memory_space<vmem>>, vector<128x256xf32>
    %c0_7 = arith.constant 0 : index
    %c0_8 = arith.constant 0 : index
    %4 = vector.load %arg5[%c0_7, %c0_8] : memref<128x256xf32, #tpu.memory_space<vmem>>, vector<128x256xf32>
    tpu.vector_store %arg5[%c0_7, %c0_8], %3 {strides = array<i32>} : memref<128x256xf32, #tpu.memory_space<vmem>>, vector<128x256xf32>,
    %c0_9 = arith.constant 0 : index
    %c0_10 = arith.constant 0 : index
    %5 = vector.load %arg3[%c0_9, %c0_10] : memref<256x128xf32, #tpu.memory_space<vmem>>, vector<256x128xf32>
    %cst = arith.constant dense<0.000000e+00> : vector<128x128xf32>
    %6 = tpu.matmul %3, %5, %cst {dimension_numbers = #tpu.dot_dimension_numbers<[1], [0], [0], [1], [0, 0, 1, 1], [], []>} : vector<128x256xf32>, vector<256x128xf32>, vector<128x128xf32> -> vector<128x128xf32>
    %c0_11 = arith.constant 0 : index
    %c0_12 = arith.constant 0 : index
    %7 = vector.load %arg4[%c0_11, %c0_12] : memref<1x128xf32, #tpu.memory_space<vmem>>, vector<1x128xf32>
    %8 = vector.broadcast %7 : vector<1x128xf32> to vector<128x128xf32>
    %9 = arith.addf %6, %8 : vector<128x128xf32>
    %c0_13 = arith.constant 0 : index
    %c0_14 = arith.constant 0 : index
    %10 = vector.load %arg6[%c0_13, %c0_14] : memref<128x128xf32, #tpu.memory_space<vmem>>, vector<128x128xf32>
    tpu.vector_store %arg6[%c0_13, %c0_14], %9 {strides = array<i32>} : memref<128x128xf32, #tpu.memory_space<vmem>>, vector<128x128xf32>,
    return
  }
  func.func @transform_1(%arg0: i32, %arg1: memref<256xi32, #tpu.memory_space<smem>>) -> (i32, i32) {
    %c0_i32 = arith.constant 0 : i32
    %c0_i32_0 = arith.constant 0 : i32
    %c0_i32_1 = arith.constant 0 : i32
    return %c0_i32, %c0_i32_0 : i32, i32
  }
  func.func @transform_2(%arg0: i32, %arg1: memref<256xi32, #tpu.memory_space<smem>>) -> (i32, i32) {
    %c0_i32 = arith.constant 0 : i32
    %c0_i32_0 = arith.constant 0 : i32
    %c0_i32_1 = arith.constant 0 : i32
    return %c0_i32, %c0_i32_0 : i32, i32
  }
  func.func @transform_3(%arg0: i32, %arg1: memref<256xi32, #tpu.memory_space<smem>>) -> (i32, i32) {
    %c0_i32 = arith.constant 0 : i32
    %c0_i32_0 = arith.constant 0 : i32
    return %arg0, %c0_i32 : i32, i32
  }
  func.func @transform_4(%arg0: i32, %arg1: memref<256xi32, #tpu.memory_space<smem>>) -> (i32, i32) {
    %c0_i32 = arith.constant 0 : i32
    %c0_i32_0 = arith.constant 0 : i32
    return %arg0, %c0_i32 : i32, i32
  }
}

</mosaic_0001>

<bundles_post_ra>
// kernel: llm_compress_embedding.1
= control target key start
LH: loop header
LB: loop body
LE: loop exit
PB: predicated region body
PF: predicated region fallthrough
CT: control target
= control target key end

     0   :  { %s871_s21 = smov [#allocation5]   ;;  %s1281_s0 = inlined_call_operand.vmem [shape: s32[256], index: 0, kind: input, shape index: {}]   ;;  %s1282_s1 = inlined_call_operand.hbm [shape: f32[1000,256], index: 1, kind: input, shape index: {}]   ;;  %s1283_s2 = inlined_call_operand.vmem [shape: f32[256,128], index: 2, kind: input, shape index: {}]   ;;  %s1284_s3 = inlined_call_operand.vmem [shape: f32[1,128], index: 3, kind: input, shape index: {}]   ;;  %s1285_s4 = inlined_call_operand.hbm [shape: f32[256,256], index: 4, kind: output, shape index: {0}]   ;;  %s1286_s5 = inlined_call_operand.hbm [shape: f32[256,128], index: 5, kind: output, shape index: {1}]  }
   0x1   :  { %s12_s20 = sshll.u32 %s1281_s0, 4  ;;  %s13_s20 = int_to_ptr.vmem [resolvable:$true] %s12_s20 }
   0x2   :  { %15 = dma.vmem_to_smem %s13_s20, 32, %s871_s21, [#allocation4] }
   0x3   :  { %835 = dma.done.wait [#allocation4], 32 }
   0x4   :  { %836 = vsyncadd [#allocation4], 4294967264 }
   0x5   :  { %18 = sfence }
   0x6   :  { %19 = vsyncpa [#allocation7], 0 }
   0x7   :  { %21 = vsyncpa [#allocation7 + $0x1], 0 }
   0x8   :  { %22 = vsyncpa [#allocation9], 0 }
   0x9   :  { %24 = vsyncpa [#allocation9 + $0x1], 0  ;;  %s912_s22 = smov 0   ;;  %s914_s23 = smov 0  }
   0xa   :  { %s916_s24 = smov 0   ;;  %s918_s25 = smov 0  }
   0xb LB: > { %1291 = sst [smem:[#allocation15_spill]] %s853_s23  ;;  %s933_s0 = sadd.s32 4294967295, %s861_s25   ;;  %s861_s25 = sphi %s918_s25, %s1297_s25   ;;  %s857_s24 = sphi %s916_s24, %s1300_s24   ;;  %s853_s23 = sphi %s914_s23, %s1299_s23   ;;  %s849_s22 = sphi %s912_s22, %s1298_s22  }
   0xc   : > { %1292 = sst [smem:[#allocation16_spill]] %s857_s24  ;;  %s598_s26 = sadd.s32 4294967294, %s861_s25  }
   0xd   : > { %s937_s27 = sadd.s32 1, %s861_s25   ;;  %s79_s28 = sadd.s32 1, %s857_s24 }
   0xe   : > { %1293 = sst [smem:[#allocation17_spill]] %s937_s27  ;;  %s76_s29 = ssub.s32 %s861_s25, %s937_s27 }
   0xf   : > { %p89_p0 = scmp.ne.s32.totalorder %s857_s24, %s853_s23  ;;  %p77_p1 = scmp.eq.s32.totalorder %s76_s29, 0 }
  0x10   : > { %p90_p2 = scmp.eq.s32.totalorder %s933_s0, 1  ;;  %p95_p3 = scmp.ne.s32.totalorder %s853_s23, %s849_s22 }
  0x11   : > { %p96_p4 = scmp.eq.s32.totalorder %s598_s26, 1  ;;  %p600_p7 = scmp.ge.s32.totalorder %s861_s25, 1 }
  0x12   : > { %s948_s30 = scalar_select %p77_p1, %s857_s24, %s79_s28  }
  0x13   : > { %p950_p5 = por %p90_p2, %p89_p0  ;;  %p954_p6 = por %p96_p4, %p95_p3 }
  0x14   : > { %1294 = sst [smem:[#allocation18_spill]] %s948_s30  ;;  %p146_p8 = scmp.lt.s32.totalorder %s861_s25, 3 }
  0x16   : > { %p147_p9 = pnand %p600_p7, %p146_p8 }
  0x17   : > { %s961_s8 = sand.u32 (!%p147_p9), 1, %s853_s23   ;;  %s603_s9 = sshll.u32 (!%p147_p9), %s933_s0, 7 }
  0x18   : > { %150 = sbr.rel (%p147_p9) target bundleno = 301 (0x12d), region = 28  ;;  %s601_s10 = sshll.u32 (!%p147_p9), %s961_s8, 8 }
  0x19   : > { %s602_s11 = sshll.u32 (!%p147_p9), %s961_s8, 7  ;;  %s966_s12 = scalar_lea.vmem (!%p147_p9), [#allocation6], %s601_s10 }
  0x1a   : > { %s968_s13 = scalar_lea.vmem (!%p147_p9), [#allocation8], %s602_s11  ;;  %s970_s14 = smov (!%p147_p9), 0  }
  0x1d LB: >> { %s179_s15 = sadd.s32 %s865_s14, %s603_s9  ;;  %s186_s16 = sshrl.u32 %s865_s14, 3  ;;  %s865_s14 = sphi %s970_s14, %s178_s14  }
  0x1e   : >> { %s180_s17 = sld [smem:[#allocation5 + %s179_s15]]  ;;  %s187_s18 = sand.u32 7, %s865_s14  }
  0x1f   : >> { %s605_s19 = sshll.u32 %s186_s16, 4 }
  0x20   : >> { %s189_s20 = sadd.s32 %s605_s19, %s187_s18 }
  0x21   : >> { %s190_s21 = scalar_lea.vmem [#allocation2], %s189_s20  ;;  %s735_s20 = scalar_lea.hbm %s1282_s1, 2000 }
  0x22   : >> { %s980_s26 = sshll.u32 %s190_s21, 4  ;;  %s194_s26 = int_to_ptr.vmem [resolvable:$true] %s980_s26 }
  0x24   : >> { %s181_s28 = sshrl.u32 %s180_s17, 3  ;;  %s182_s29 = sand.u32 7, %s180_s17  }
  0x25   : >> { %s604_s10 = sshll.u32 %s181_s28, 4 }
  0x26   : >> { %s184_s11 = sadd.s32 %s604_s10, %s182_s29 }
  0x27   : >> { %s185_s23 = scalar_lea.hbm %s1282_s1, %s184_s11 }
  0x28   : >> { %s986_s27 = sshll.u32 %s185_s23, 4  ;;  %s192_s27 = int_to_ptr.hbm [resolvable:$true] %s986_s27 }
  0x29   : >> { %s731_s15 = sshra.s32 %s192_s27, 4  ;;  %s732_s15 = int_to_ptr.hbm [resolvable:$true] %s731_s15 }
  0x2a   : >> { %s733_s16 = scalar_lea.hbm %s732_s15, 2  ;;  %p736_p11 = scmp.lt.s32.totalorder %s732_s15, %s1282_s1 }
  0x2b   : >> { %p734_p10 = scmp.ne.s32.totalorder %s732_s15, %s733_s16  ;;  %p737_p12 = scmp.lt.s32.totalorder %s735_s20, %s733_s16 }
  0x2d   : >> { %p738_p13 = por %p737_p12, %p736_p11 }
  0x2f   : >> { %p739_p0 = pnand %p738_p13, %p734_p10 }
  0x31   : >> { %742 = shalt.err (!%p739_p0)  }
  0x32   : >> { %s743_s23 = sshra.s32 %s194_s26, 4  ;;  %s872_s30 = smov [#allocation2]   ;;  %s744_s23 = int_to_ptr.vmem [resolvable:$true] %s743_s23 }
  0x33   : >> { %s745_s24 = scalar_lea.vmem %s744_s23, 2  ;;  %s747_s28 = scalar_lea.vmem %s872_s30, 256 }
  0x34   : >> { %p746_p1 = scmp.ne.s32.totalorder %s744_s23, %s745_s24  ;;  %p748_p2 = scmp.lt.s32.totalorder %s744_s23, [#allocation2] }
  0x35   : >> { %p749_p3 = scmp.lt.s32.totalorder %s747_s28, %s745_s24 }
  0x37   : >> { %p750_p4 = por %p749_p3, %p748_p2 }
  0x39   : >> { %p751_p7 = pnand %p750_p4, %p746_p1 }
  0x3b   : >> { %754 = shalt.err (!%p751_p7)  }
  0x3c   : >> { %s873_s29 = smov 128   ;;  %s874_s10 = smov 1  }
  0x3d   : >> { %198 = dma.hbm_to_vmem [thread:$0]  %s192_s27, 32, %s194_s26, [#allocation3], %s873_s29, %s873_s29, %s874_s10 }
  0x3e   : >> { %s178_s14 = sadd.s32 1, %s865_s14  }
  0x3f   : >> { %p175_p8 = scmp.ge.s32.totalorder %s178_s14, 128  }
  0x40   : > { %s867_s11 = smov (%p175_p8), 0  }
  0x41   : > { %177 = sbr.rel (!%p175_p8) target bundleno = 29 (0x1d), region = 93 }
  0x46 LB: >> { %837 = dma.done.wait [#allocation3], 32  ;;  %s869_s11 = sphi %s867_s11, %s204_s11  }
  0x47   : >> { %838 = vsyncadd [#allocation3], 4294967264  ;;  %s204_s11 = sadd.s32 1, %s869_s11  }
  0x48   : >> { %p201_p9 = scmp.ge.s32.totalorder %s204_s11, 128  }
  0x49   : > { %v287_v0 = vld [vmem:[%s1283_s2 + $0x78] sm:$0xff] (%p201_p9)  ;;  %v286_v1 = vld [vmem:[%s1283_s2 + $0x70] sm:$0xff] (%p201_p9)  ;;  %v285_v4 = vld [vmem:[%s1283_s2 + $0x68] sm:$0xff] (%p201_p9)  ;;  %s617_s28 = sshll.u32 (%p201_p9), %s933_s0, 8  ;;  %s473_s15 = sshll.u32 (%p201_p9), %s966_s12, 4  ;;  %s474_s15 = int_to_ptr.vmem [resolvable:$true] %s473_s15 }
  0x4a   : > { %203 = sbr.rel (!%p201_p9) target bundleno = 70 (0x46), region = 104  ;;  %v303_v2 = vld [vmem:[%s1283_s2 + $0xf8] sm:$0xff] (%p201_p9)  ;;  %619 = vmatpush.msra.mxu2 (%p201_p9), %v287_v0  ;;  %v302_v3 = vld [vmem:[%s1283_s2 + $0xf0] sm:$0xff] (%p201_p9)  ;;  %308 = vmatpush.msra.mxu0 (%p201_p9), %v287_v0  ;;  %v301_v5 = vld [vmem:[%s1283_s2 + $0xe8] sm:$0xff] (%p201_p9)  ;;  %s472_s11 = scalar_lea.hbm (%p201_p9), %s1285_s4, %s617_s28 }
  0x4b   : > { %635 = vmatpush.msra.mxu3 (%p201_p9), %v303_v2  ;;  %373 = vmatpush.msra.mxu1 (%p201_p9), %v303_v2  ;;  %v284_v6 = vld [vmem:[%s1283_s2 + $0x60] sm:$0xff] (%p201_p9)  ;;  %v283_v8 = vld [vmem:[%s1283_s2 + $0x58] sm:$0xff] (%p201_p9)  ;;  %v282_v10 = vld [vmem:[%s1283_s2 + $0x50] sm:$0xff] (%p201_p9)  ;;  %s475_s16 = sshll.u32 (%p201_p9), %s472_s11, 4  ;;  %s455_s27 = scalar_lea.sflag (%p201_p9), [#allocation7], %s961_s8  ;;  %s476_s16 = int_to_ptr.hbm [resolvable:$true] %s475_s16 }
  0x4c   : > { %620 = vmatpush.msra.mxu2 (%p201_p9), %v286_v1  ;;  %309 = vmatpush.msra.mxu0 (%p201_p9), %v286_v1  ;;  %v300_v7 = vld [vmem:[%s1283_s2 + $0xe0] sm:$0xff] (%p201_p9)  ;;  %v299_v9 = vld [vmem:[%s1283_s2 + $0xd8] sm:$0xff] (%p201_p9)  ;;  %v298_v11 = vld [vmem:[%s1283_s2 + $0xd0] sm:$0xff] (%p201_p9)  ;;  %s769_s26 = sshra.s32 (%p201_p9), %s476_s16, 4  ;;  %s775_s20 = scalar_lea.hbm (%p201_p9), %s1285_s4, 512  ;;  %s770_s26 = int_to_ptr.hbm [resolvable:$true] %s769_s26 }
  0x4d   : > { %636 = vmatpush.msra.mxu3 (%p201_p9), %v302_v3  ;;  %374 = vmatpush.msra.mxu1 (%p201_p9), %v302_v3  ;;  %v281_v12 = vld [vmem:[%s1283_s2 + $0x48] sm:$0xff] (%p201_p9)  ;;  %v1044_v14 = vld [vmem:[#allocation2 + $0x80] sm:$0xff] (%p201_p9)  ;;  %v1062_v19 = vld [vmem:[#allocation2 + $0x90] sm:$0xff] (%p201_p9)  ;;  %s771_s14 = scalar_lea.hbm (%p201_p9), %s770_s26, 256  ;;  %p776_p13 = scmp.lt.s32.totalorder (%p201_p9), %s770_s26, %s1285_s4 }
  0x4e   : > { %621 = vmatpush.msra.mxu2 (%p201_p9), %v285_v4  ;;  %310 = vmatpush.msra.mxu0 (%p201_p9), %v285_v4  ;;  %v297_v13 = vld [vmem:[%s1283_s2 + $0xc8] sm:$0xff] (%p201_p9)  ;;  %256 = vst [vmem:[%s966_s12 + $0x80] sm:$0xff] (%p201_p9), %v1044_v14  ;;  %v280_v16 = vld [vmem:[%s1283_s2 + $0x40] sm:$0xff] (%p201_p9)  ;;  %v279_v20 = vld [vmem:[%s1283_s2 + $0x38] sm:$0xff] (%p201_p9)  ;;  %p772_p10 = scmp.ne.s32.totalorder (%p201_p9), %s770_s26, %s771_s14  ;;  %p777_p0 = scmp.lt.s32.totalorder (%p201_p9), %s775_s20, %s771_s14 }
  0x4f   : > { %637 = vmatpush.msra.mxu3 %v301_v5  ;;  %375 = vmatpush.msra.mxu1 %v301_v5  ;;  %v1048_v15 = vld [vmem:[#allocation2 + $0x88] sm:$0xff]  ;;  %v296_v17 = vld [vmem:[%s1283_s2 + $0xc0] sm:$0xff]  ;;  %v295_v21 = vld [vmem:[%s1283_s2 + $0xb8] sm:$0xff]  ;;  %258 = vst [vmem:[%s966_s12 + $0x90] sm:$0xff] %v1062_v19 }
  0x50   : > { %622 = vmatpush.msra.mxu2 %v284_v6  ;;  %311 = vmatpush.msra.mxu0 %v284_v6  ;;  %257 = vst [vmem:[%s966_s12 + $0x88] sm:$0xff] %v1048_v15  ;;  %v1058_v18 = vld [vmem:[#allocation2] sm:$0xff]  ;;  %v1072_v22 = vld [vmem:[#allocation2 + $0x8] sm:$0xff]  ;;  %v1076_v23 = vld [vmem:[#allocation2 + $0x98] sm:$0xff]  ;;  %p773_p11 = pnand %p772_p10, %p950_p5  ;;  %p778_p1 = por %p777_p0, %p776_p13 }
  0x51   : > { %638 = vmatpush.msra.mxu3 %v300_v7  ;;  %376 = vmatpush.msra.mxu1 %v300_v7  ;;  %240 = vst [vmem:[%s966_s12] sm:$0xff] %v1058_v18  ;;  %v278_v24 = vld [vmem:[%s1283_s2 + $0x30] sm:$0xff]  ;;  %v1090_v27 = vld [vmem:[#allocation2 + $0xa0] sm:$0xff]  ;;  %v277_v28 = vld [vmem:[%s1283_s2 + $0x28] sm:$0xff] }
  0x52   : > { %623 = vmatpush.msra.mxu2 %v283_v8  ;;  %312 = vmatpush.msra.mxu0 %v283_v8  ;;  %241 = vst [vmem:[%s966_s12 + $0x8] sm:$0xff] %v1072_v22  ;;  %v294_v25 = vld [vmem:[%s1283_s2 + $0xb0] sm:$0xff]  ;;  %v293_v29 = vld [vmem:[%s1283_s2 + $0xa8] sm:$0xff]  ;;  %v1100_v30 = vld [vmem:[#allocation2 + $0x18] sm:$0xff]  ;;  %p774_p12 = pneg %p773_p11 }
  0x53   : > { %639 = vmatpush.msra.mxu3 %v299_v9  ;;  %377 = vmatpush.msra.mxu1 %v299_v9  ;;  %259 = vst [vmem:[%s966_s12 + $0x98] sm:$0xff] %v1076_v23  ;;  %v1086_v26 = vld [vmem:[#allocation2 + $0x10] sm:$0xff]  ;;  %v1104_v31 = vld [vmem:[#allocation2 + $0xa8] sm:$0xff]  ;;  %v276_v32 = vld [vmem:[%s1283_s2 + $0x20] sm:$0xff] }
  0x54   : > { %624 = vmatpush.msra.mxu2 %v282_v10  ;;  %313 = vmatpush.msra.mxu0 %v282_v10  ;;  %242 = vst [vmem:[%s966_s12 + $0x10] sm:$0xff] %v1086_v26  ;;  %v292_v33 = vld [vmem:[%s1283_s2 + $0xa0] sm:$0xff]  ;;  %v1118_v35 = vld [vmem:[#allocation2 + $0xb0] sm:$0xff]  ;;  %v275_v36 = vld [vmem:[%s1283_s2 + $0x18] sm:$0xff]  ;;  %p779_p2 = pnand %p778_p1, %p774_p12 }
  0x55   : > { %640 = vmatpush.msra.mxu3 %v298_v11  ;;  %378 = vmatpush.msra.mxu1 %v298_v11  ;;  %260 = vst [vmem:[%s966_s12 + $0xa0] sm:$0xff] %v1090_v27  ;;  %v1114_v34 = vld [vmem:[#allocation2 + $0x20] sm:$0xff]  ;;  %v291_v37 = vld [vmem:[%s1283_s2 + $0x98] sm:$0xff]  ;;  %v1128_v38 = vld [vmem:[#allocation2 + $0x28] sm:$0xff] }
  0x56   : > { %625 = vmatpush.msra.mxu2 %v281_v12  ;;  %314 = vmatpush.msra.mxu0 %v281_v12  ;;  %243 = vst [vmem:[%s966_s12 + $0x18] sm:$0xff] %v1100_v30  ;;  %v274_v39 = vld [vmem:[%s1283_s2 + $0x10] sm:$0xff]  ;;  %v1138_v41 = vld [vmem:[#allocation2 + $0xb8] sm:$0xff]  ;;  %v273_v43 = vld [vmem:[%s1283_s2 + $0x8] sm:$0xff] }
  0x57   : > { %641 = vmatpush.msra.mxu3 %v297_v13  ;;  %379 = vmatpush.msra.mxu1 %v297_v13  ;;  %261 = vst [vmem:[%s966_s12 + $0xa8] sm:$0xff] %v1104_v31  ;;  %v290_v40 = vld [vmem:[%s1283_s2 + $0x90] sm:$0xff]  ;;  %v289_v44 = vld [vmem:[%s1283_s2 + $0x88] sm:$0xff]  ;;  %v1152_v45 = vld [vmem:[#allocation2 + $0xc0] sm:$0xff] }
  0x58   : > { %626 = vmatpush.msra.mxu2 %v280_v16  ;;  %315 = vmatpush.msra.mxu0 %v280_v16  ;;  %244 = vst [vmem:[%s966_s12 + $0x20] sm:$0xff] %v1114_v34  ;;  %v1142_v42 = vld [vmem:[#allocation2 + $0x30] sm:$0xff]  ;;  %v272_v46 = vld [vmem:[%s1283_s2] sm:$0xff]  ;;  %v215_v48 = vld [vmem:[#allocation2 + $0x38] sm:$0xff] }
  0x59   : > { %642 = vmatpush.msra.mxu3 %v296_v17  ;;  %380 = vmatpush.msra.mxu1 %v296_v17  ;;  %262 = vst [vmem:[%s966_s12 + $0xb0] sm:$0xff] %v1118_v35  ;;  %v288_v47 = vld [vmem:[%s1283_s2 + $0x80] sm:$0xff]  ;;  %v233_v49 = vld [vmem:[#allocation2 + $0xc8] sm:$0xff]  ;;  %v234_v51 = vld [vmem:[#allocation2 + $0xd0] sm:$0xff] }
  0x5a   : > { %627 = vmatpush.msra.mxu2 %v279_v20  ;;  %316 = vmatpush.msra.mxu0 %v279_v20  ;;  %245 = vst [vmem:[%s966_s12 + $0x28] sm:$0xff] %v1128_v38  ;;  %v216_v50 = vld [vmem:[#allocation2 + $0x40] sm:$0xff]  ;;  %v217_v52 = vld [vmem:[#allocation2 + $0x48] sm:$0xff]  ;;  %v235_v53 = vld [vmem:[#allocation2 + $0xd8] sm:$0xff] }
  0x5b   : > { %643 = vmatpush.msra.mxu3 %v295_v21  ;;  %381 = vmatpush.msra.mxu1 %v295_v21  ;;  %263 = vst [vmem:[%s966_s12 + $0xb8] sm:$0xff] %v1138_v41  ;;  %v218_v54 = vld [vmem:[#allocation2 + $0x50] sm:$0xff]  ;;  %v236_v55 = vld [vmem:[#allocation2 + $0xe0] sm:$0xff]  ;;  %v219_v56 = vld [vmem:[#allocation2 + $0x58] sm:$0xff] }
  0x5c   : > { %628 = vmatpush.msra.mxu2 %v278_v24  ;;  %317 = vmatpush.msra.mxu0 %v278_v24  ;;  %246 = vst [vmem:[%s966_s12 + $0x30] sm:$0xff] %v1142_v42  ;;  %v237_v57 = vld [vmem:[#allocation2 + $0xe8] sm:$0xff]  ;;  %v220_v58 = vld [vmem:[#allocation2 + $0x60] sm:$0xff]  ;;  %v238_v59 = vld [vmem:[#allocation2 + $0xf0] sm:$0xff] }
  0x5d   : > { %644 = vmatpush.msra.mxu3 %v294_v25  ;;  %382 = vmatpush.msra.mxu1 %v294_v25  ;;  %264 = vst [vmem:[%s966_s12 + $0xc0] sm:$0xff] %v1152_v45  ;;  %v221_v60 = vld [vmem:[#allocation2 + $0x68] sm:$0xff]  ;;  %v239_v61 = vld [vmem:[#allocation2 + $0xf8] sm:$0xff]  ;;  %v222_v62 = vld [vmem:[#allocation2 + $0x70] sm:$0xff] }
  0x5e   : > { %629 = vmatpush.msra.mxu2 %v277_v28  ;;  %318 = vmatpush.msra.mxu0 %v277_v28  ;;  %247 = vst [vmem:[%s966_s12 + $0x38] sm:$0xff] %v215_v48  ;;  %v223_v63 = vld [vmem:[#allocation2 + $0x78] sm:$0xff] }
  0x5f   : > { %645 = vmatpush.msra.mxu3 %v293_v29  ;;  %383 = vmatpush.msra.mxu1 %v293_v29  ;;  %265 = vst [vmem:[%s966_s12 + $0xc8] sm:$0xff] %v233_v49 }
  0x60   : > { %630 = vmatpush.msra.mxu2 %v276_v32  ;;  %319 = vmatpush.msra.mxu0 %v276_v32  ;;  %248 = vst [vmem:[%s966_s12 + $0x40] sm:$0xff] %v216_v50 }
  0x61   : > { %646 = vmatpush.msra.mxu3 %v292_v33  ;;  %384 = vmatpush.msra.mxu1 %v292_v33  ;;  %266 = vst [vmem:[%s966_s12 + $0xd0] sm:$0xff] %v234_v51 }
  0x62   : > { %631 = vmatpush.msra.mxu2 %v275_v36  ;;  %320 = vmatpush.msra.mxu0 %v275_v36  ;;  %249 = vst [vmem:[%s966_s12 + $0x48] sm:$0xff] %v217_v52 }
  0x63   : > { %647 = vmatpush.msra.mxu3 %v291_v37  ;;  %385 = vmatpush.msra.mxu1 %v291_v37  ;;  %267 = vst [vmem:[%s966_s12 + $0xd8] sm:$0xff] %v235_v53 }
  0x64   : > { %632 = vmatpush.msra.mxu2 %v274_v39  ;;  %321 = vmatpush.msra.mxu0 %v274_v39  ;;  %250 = vst [vmem:[%s966_s12 + $0x50] sm:$0xff] %v218_v54 }
  0x65   : > { %648 = vmatpush.msra.mxu3 %v290_v40  ;;  %386 = vmatpush.msra.mxu1 %v290_v40  ;;  %268 = vst [vmem:[%s966_s12 + $0xe0] sm:$0xff] %v236_v55 }
  0x66   : > { %633 = vmatpush.msra.mxu2 %v273_v43  ;;  %322 = vmatpush.msra.mxu0 %v273_v43  ;;  %251 = vst [vmem:[%s966_s12 + $0x58] sm:$0xff] %v219_v56 }
  0x67   : > { %649 = vmatpush.msra.mxu3 %v289_v44  ;;  %387 = vmatpush.msra.mxu1 %v289_v44  ;;  %269 = vst [vmem:[%s966_s12 + $0xe8] sm:$0xff] %v237_v57 }
  0x68   : > { %634 = vmatpush.msra.mxu2 %v272_v46  ;;  %323 = vmatpush.msra.mxu0 %v272_v46  ;;  %252 = vst [vmem:[%s966_s12 + $0x60] sm:$0xff] %v220_v58 }
  0x69   : > { %650 = vmatpush.msra.mxu3 %v288_v47  ;;  %348 = vmatmul.f32.vlgmr.msra.gmra.mxu2 %v1044_v14  ;;  %270 = vst [vmem:[%s966_s12 + $0xf0] sm:$0xff] %v238_v59 }
  0x6a   : > { %413 = vmatmul.f32.vlgmr.msra.gmra.mxu3 %v1048_v15  ;;  %388 = vmatpush.msra.mxu1 %v288_v47  ;;  %253 = vst [vmem:[%s966_s12 + $0x68] sm:$0xff] %v221_v60 }
  0x6b   : > { %324 = vmatmul.f32.vlgmr.msra.gmra.mxu0 %v1058_v18  ;;  %389 = vmatmul.f32.vlgmr.msra.gmra.mxu1 %v1072_v22  ;;  %271 = vst [vmem:[%s966_s12 + $0xf8] sm:$0xff] %v239_v61 }
  0x6c   : > { %254 = vst [vmem:[%s966_s12 + $0x70] sm:$0xff] %v222_v62 }
  0x6d   : > { %255 = vst [vmem:[%s966_s12 + $0x78] sm:$0xff] %v223_v63 }
  0x71   : > { %351 = vmatmul.f32.gmra.mxu2 %v1062_v19 }
  0x72   : > { %416 = vmatmul.f32.gmra.mxu3 %v1076_v23 }
  0x73   : > { %327 = vmatmul.f32.gmra.mxu0 %v1086_v26  ;;  %392 = vmatmul.f32.gmra.mxu1 %v1100_v30 }
  0x79   : > { %354 = vmatmul.f32.gmra.mxu2 %v1090_v27 }
  0x7a   : > { %419 = vmatmul.f32.gmra.mxu3 %v1104_v31 }
  0x7b   : > { %330 = vmatmul.f32.gmra.mxu0 %v1114_v34  ;;  %395 = vmatmul.f32.gmra.mxu1 %v1128_v38 }
  0x81   : > { %357 = vmatmul.f32.gmra.mxu2 %v1118_v35 }
  0x82   : > { %422 = vmatmul.f32.gmra.mxu3 %v1138_v41 }
  0x83   : > { %333 = vmatmul.f32.gmra.mxu0 %v1142_v42  ;;  %398 = vmatmul.f32.gmra.mxu1 %v215_v48 }
  0x89   : > { %360 = vmatmul.f32.gmra.mxu2 %v1152_v45 }
  0x8a   : > { %425 = vmatmul.f32.gmra.mxu3 %v233_v49 }
  0x8b   : > { %336 = vmatmul.f32.gmra.mxu0 %v216_v50  ;;  %401 = vmatmul.f32.gmra.mxu1 %v217_v52 }
  0x91   : > { %363 = vmatmul.f32.gmra.mxu2 %v234_v51 }
  0x92   : > { %428 = vmatmul.f32.gmra.mxu3 %v235_v53 }
  0x93   : > { %339 = vmatmul.f32.gmra.mxu0 %v218_v54  ;;  %404 = vmatmul.f32.gmra.mxu1 %v219_v56 }
  0x99   : > { %366 = vmatmul.f32.gmra.mxu2 %v236_v55 }
  0x9a   : > { %431 = vmatmul.f32.gmra.mxu3 %v237_v57 }
  0x9b   : > { %342 = vmatmul.f32.gmra.mxu0 %v220_v58  ;;  %407 = vmatmul.f32.gmra.mxu1 %v221_v60 }
  0xa1   : > { %369 = vmatmul.f32.gmra.mxu2 %v238_v59 }
  0xa2   : > { %434 = vmatmul.f32.gmra.mxu3 %v239_v61 }
  0xa3   : > { %345 = vmatmul.f32.gmra.mxu0 %v222_v62  ;;  %410 = vmatmul.f32.gmra.mxu1 %v223_v63 }
  0xa4   : > { %782 = shalt.err (!%p779_p2)
}
  0xa5   : > { %s875_s12 = smov 256   ;;  %s876_s23 = smov 16   ;;  %v1213_v0 = vld [vmem:[%s1284_s3] ss:$0 sm:$0xff] }
  0xa6   : > { %651 = dma.vmem_to_hbm [thread:$0]  (%p950_p5), %s474_s15, 4096, %s476_s16, %s455_s27, %s875_s12, %s875_s12, %s876_s23  }
  0xa7   : > { %s489_s10 = scalar_lea.hbm %s1286_s5, %s603_s9  ;;  %s490_s11 = sshll.u32 %s968_s13, 4  ;;  %s491_s11 = int_to_ptr.vmem [resolvable:$true] %s490_s11 }
  0xa8   : > { %s492_s15 = sshll.u32 %s489_s10, 4  ;;  %s460_s0 = scalar_lea.sflag [#allocation9], %s961_s8  ;;  %s493_s15 = int_to_ptr.hbm [resolvable:$true] %s492_s15 }
  0xa9   : > { %s797_s16 = sshra.s32 %s493_s15, 4  ;;  %s803_s14 = scalar_lea.hbm %s1286_s5, 256  ;;  %s798_s16 = int_to_ptr.hbm [resolvable:$true] %s797_s16 }
  0xaa   : > { %s799_s9 = scalar_lea.hbm %s798_s16, 128  ;;  %p804_p8 = scmp.lt.s32.totalorder %s798_s16, %s1286_s5 }
  0xab   : > { %p800_p3 = scmp.ne.s32.totalorder %s798_s16, %s799_s9  ;;  %p805_p9 = scmp.lt.s32.totalorder %s803_s14, %s799_s9 }
  0xad   : > { %p801_p4 = pnand %p800_p3, %p950_p5  ;;  %p806_p10 = por %p805_p9, %p804_p8 }
  0xaf   : > { %p802_p7 = pneg %p801_p4 }
  0xb1   : > { %p807_p11 = pnand %p806_p10, %p802_p7 }
  0xe8   : > { %v325_v1 = vpop.f32.mrf.mxu0  ;;  %v390_v2 = vpop.f32.mrf.mxu1 }
  0xe9   : > { %v326_v3 = vadd.f32 %v1213_v0, %v325_v1 }
  0xeb   : > { %v391_v4 = vadd.f32 %v390_v2, %v326_v3 }
  0xec   : > { %v349_v5 = vpop.f32.mrf.mxu2 }
  0xed   : > { %v414_v6 = vpop.f32.mrf.mxu3  ;;  %v350_v7 = vadd.f32 %v1213_v0, %v349_v5  ;;  %438 = vst [vmem:[%s968_s13] sm:$0xff] %v391_v4 }
  0xef   : > { %v415_v8 = vadd.f32 %v414_v6, %v350_v7 }
  0xf0   : > { %v328_v9 = vpop.f32.mrf.mxu0  ;;  %v393_v10 = vpop.f32.mrf.mxu1 }
  0xf1   : > { %446 = vst [vmem:[%s968_s13 + $0x40] sm:$0xff] %v415_v8  ;;  %v329_v11 = vadd.f32 %v1213_v0, %v328_v9 }
  0xf3   : > { %v394_v12 = vadd.f32 %v393_v10, %v329_v11 }
  0xf4   : > { %v352_v13 = vpop.f32.mrf.mxu2 }
  0xf5   : > { %v417_v14 = vpop.f32.mrf.mxu3  ;;  %v353_v15 = vadd.f32 %v1213_v0, %v352_v13  ;;  %439 = vst [vmem:[%s968_s13 + $0x8] sm:$0xff] %v394_v12 }
  0xf7   : > { %v418_v16 = vadd.f32 %v417_v14, %v353_v15 }
  0xf8   : > { %v331_v17 = vpop.f32.mrf.mxu0  ;;  %v396_v18 = vpop.f32.mrf.mxu1 }
  0xf9   : > { %447 = vst [vmem:[%s968_s13 + $0x48] sm:$0xff] %v418_v16  ;;  %v332_v19 = vadd.f32 %v1213_v0, %v331_v17 }
  0xfb   : > { %v397_v20 = vadd.f32 %v396_v18, %v332_v19 }
  0xfc   : > { %v355_v21 = vpop.f32.mrf.mxu2 }
  0xfd   : > { %v420_v22 = vpop.f32.mrf.mxu3  ;;  %v356_v23 = vadd.f32 %v1213_v0, %v355_v21  ;;  %440 = vst [vmem:[%s968_s13 + $0x10] sm:$0xff] %v397_v20 }
  0xff   : > { %v421_v24 = vadd.f32 %v420_v22, %v356_v23 }
 0x100   : > { %v334_v25 = vpop.f32.mrf.mxu0  ;;  %v399_v26 = vpop.f32.mrf.mxu1 }
 0x101   : > { %448 = vst [vmem:[%s968_s13 + $0x50] sm:$0xff] %v421_v24  ;;  %v335_v27 = vadd.f32 %v1213_v0, %v334_v25 }
 0x103   : > { %v400_v28 = vadd.f32 %v399_v26, %v335_v27 }
 0x104   : > { %v358_v29 = vpop.f32.mrf.mxu2 }
 0x105   : > { %v423_v30 = vpop.f32.mrf.mxu3  ;;  %v359_v31 = vadd.f32 %v1213_v0, %v358_v29  ;;  %441 = vst [vmem:[%s968_s13 + $0x18] sm:$0xff] %v400_v28 }
 0x107   : > { %v424_v32 = vadd.f32 %v423_v30, %v359_v31 }
 0x108   : > { %v337_v33 = vpop.f32.mrf.mxu0  ;;  %v402_v34 = vpop.f32.mrf.mxu1 }
 0x109   : > { %449 = vst [vmem:[%s968_s13 + $0x58] sm:$0xff] %v424_v32  ;;  %v338_v35 = vadd.f32 %v1213_v0, %v337_v33 }
 0x10b   : > { %v403_v36 = vadd.f32 %v402_v34, %v338_v35 }
 0x10c   : > { %v361_v37 = vpop.f32.mrf.mxu2 }
 0x10d   : > { %v426_v38 = vpop.f32.mrf.mxu3  ;;  %v362_v39 = vadd.f32 %v1213_v0, %v361_v37  ;;  %442 = vst [vmem:[%s968_s13 + $0x20] sm:$0xff] %v403_v36 }
 0x10f   : > { %v427_v40 = vadd.f32 %v426_v38, %v362_v39 }
 0x110   : > { %v340_v41 = vpop.f32.mrf.mxu0  ;;  %v405_v42 = vpop.f32.mrf.mxu1 }
 0x111   : > { %450 = vst [vmem:[%s968_s13 + $0x60] sm:$0xff] %v427_v40  ;;  %v341_v43 = vadd.f32 %v1213_v0, %v340_v41 }
 0x113   : > { %v406_v44 = vadd.f32 %v405_v42, %v341_v43 }
 0x114   : > { %v364_v45 = vpop.f32.mrf.mxu2 }
 0x115   : > { %v429_v46 = vpop.f32.mrf.mxu3  ;;  %v365_v47 = vadd.f32 %v1213_v0, %v364_v45  ;;  %443 = vst [vmem:[%s968_s13 + $0x28] sm:$0xff] %v406_v44 }
 0x117   : > { %v430_v48 = vadd.f32 %v429_v46, %v365_v47 }
 0x118   : > { %v343_v49 = vpop.f32.mrf.mxu0  ;;  %v408_v50 = vpop.f32.mrf.mxu1 }
 0x119   : > { %451 = vst [vmem:[%s968_s13 + $0x68] sm:$0xff] %v430_v48  ;;  %v344_v51 = vadd.f32 %v1213_v0, %v343_v49 }
 0x11b   : > { %v409_v52 = vadd.f32 %v408_v50, %v344_v51 }
 0x11c   : > { %v367_v53 = vpop.f32.mrf.mxu2 }
 0x11d   : > { %v432_v54 = vpop.f32.mrf.mxu3  ;;  %v368_v55 = vadd.f32 %v1213_v0, %v367_v53  ;;  %444 = vst [vmem:[%s968_s13 + $0x30] sm:$0xff] %v409_v52 }
 0x11f   : > { %v433_v56 = vadd.f32 %v432_v54, %v368_v55 }
 0x120   : > { %v346_v57 = vpop.f32.mrf.mxu0  ;;  %v411_v58 = vpop.f32.mrf.mxu1 }
 0x121   : > { %452 = vst [vmem:[%s968_s13 + $0x70] sm:$0xff] %v433_v56  ;;  %v347_v59 = vadd.f32 %v1213_v0, %v346_v57 }
 0x123   : > { %v412_v60 = vadd.f32 %v411_v58, %v347_v59 }
 0x124   : > { %v370_v61 = vpop.f32.mrf.mxu2 }
 0x125   : > { %v435_v62 = vpop.f32.mrf.mxu3  ;;  %v371_v63 = vadd.f32 %v1213_v0, %v370_v61  ;;  %445 = vst [vmem:[%s968_s13 + $0x38] sm:$0xff] %v412_v60 }
 0x127   : > { %v436_v1 = vadd.f32 %v435_v62, %v371_v63 }
 0x129   : > { %453 = vst [vmem:[%s968_s13 + $0x78] sm:$0xff] %v436_v1 }
 0x12a   : > { %810 = shalt.err (!%p807_p11)
}
 0x12b   : > { %s877_s8 = smov 128   ;;  %s878_s13 = smov 8  }
 0x12c   : > { %652 = dma.vmem_to_hbm [thread:$0]  (%p950_p5), %s491_s11, 2048, %s493_s15, %s460_s0, %s877_s8, %s877_s8, %s878_s13  }
 0x12d PF: > { %p662_p12 = scmp.ge.s32.totalorder %s861_s25, 2  ;;  %s507_s20 = sand.u32 1, %s849_s22  }
 0x12e   : > { %s508_s17 = scalar_lea.sflag [#allocation7], %s507_s20 }
 0x12f   : > { %p656_p13 = pnand %p662_p12, %p954_p6 }
 0x131   : > { %p657_p0 = pneg %p656_p13 }
 0x133   : > { %840 = dma.done.wait (%p657_p0), %s508_s17, 4096  }
 0x134   : > { %842 = vsyncadd (%p657_p0), %s508_s17, 4294963200  ;;  %s518_s21 = scalar_lea.sflag [#allocation9], %s507_s20 }
 0x135   : > { %844 = dma.done.wait (%p657_p0), %s518_s21, 2048  }
 0x136   : > { %846 = vsyncadd (%p657_p0), %s518_s21, 4294965248  ;;  %s1297_s25 = sld [smem:[#allocation17_spill]] }
 0x137   : > { %s1298_s22 = sld [smem:[#allocation15_spill]] }
 0x138   : > { %s1299_s23 = sld [smem:[#allocation16_spill]] }
 0x139   : > { %s1300_s24 = sld [smem:[#allocation18_spill]] }
 0x13c   : > { %p27_p5 = scmp.ge.s32.totalorder %s1297_s25, 4  }
 0x13e   :  { %29 = sbr.rel (!%p27_p5) target bundleno = 11 (0xb), region = 115 }
 0x143   :  { %524 = vsyncpa [#allocation7], 1 }
 0x144   :  { %526 = vsyncpa [#allocation7 + $0x1], 1 }
 0x145   :  { %527 = vsyncpa [#allocation9], 1 }
 0x146   :  { %529 = vsyncpa [#allocation9 + $0x1], 1 }
 0x147   :  { %530 = vsyncmov [#allocation3] }
 0x14a   :  { %s531_s6 = vpop.sfrf %530 }
 0x14b   :  { %p615_p6 = scmp.ne.s32.totalorder %s531_s6, 0 }
 0x14d   :  { %535 = shalt.err (%p615_p6)  }

</bundles_post_ra>
